<compile_context>
chip_gen: v5e
topology: v5e:2x2
jax: 0.10.0
libtpu: 0.0.40
codegen_flags: <defaults>
</compile_context>

<pallas_src>
import functools

import jax
import jax.numpy as jnp
from jax import lax
from jax.experimental import pallas as pl
from jax.experimental.pallas import tpu as pltpu


def _geo_cross_attn_kernel(q_ref, k_ref, v_ref, o_ref, *, scale):
    # q_ref: (T, N, Dh)   k_ref: (T, NK, Dh)
    # v_ref: (T, Dv, NK)  o_ref: (T, Dv, N)   (lane-dense v / output layouts)
    q = q_ref[...]
    k = k_ref[...]
    v = v_ref[...]

    # Batched q @ k^T without materializing k.T: contract the trailing head
    # dims directly so the MXU consumes k in its native layout. f32 accumulate.
    # TODO(synk): at production N/NK, if accuracy allows, cast q/k (and p) to
    # bf16 for the MXU and do the exp in bf16 on v6e/v7x (EUP-bound regime);
    # both exceed the 1e-5 unit-test tolerance so they stay off here.
    s = lax.dot_general(
        q, k,
        dimension_numbers=(((2,), (2,)), ((0,), (0,))),
        preferred_element_type=jnp.float32,
    )  # (T, N, NK)

    # Apply the attention scale to the f32 scores (reference rounding);
    # skipped when scale == 1.0 (the module default here).
    if scale != 1.0:
        s = s * jnp.float32(scale)

    # Numerically stable softmax statistics in f32.
    m = jnp.max(s, axis=-1, keepdims=True)        # (T, N, 1)
    p = jnp.exp(s - m)                            # (T, N, NK), f32
    denom = jnp.sum(p, axis=-1)                   # (T, N)

    # Lane-dense epilogue: contract NK of v (T, Dv, NK) against p (T, N, NK)
    # -> (T, Dv, N), so the output's last (lane) dim is N, not Dv=3.
    out = lax.dot_general(
        v, p.astype(v.dtype),
        dimension_numbers=(((2,), (2,)), ((0,), (0,))),
        preferred_element_type=jnp.float32,
    )  # (T, Dv, N)

    # Deferred softmax normalization on the small (T, Dv, N) result.
    # EUP approx reciprocal + one Newton-Raphson step: ~1e-7 relative error.
    r = pl.reciprocal(denom, approx=True)
    r = r * (2.0 - denom * r)
    out = out * r[:, None, :]

    o_ref[...] = out.astype(o_ref.dtype)


def _round_up(x, m):
    return ((x + m - 1) // m) * m


def _pick_bh_tile(bh, n, nk, dh, dv, itemsize, vmem_budget=20 << 20,
                  min_grid_steps=8):
    """Pick the per-grid-step (batch*head) tile.

    The cost model accounts for the (8, 128) VMEM tiled layout (last dim
    padded to 128, second-to-last to 8), double-buffered pipeline copies of
    every input/output tile, and the live f32 intermediates (scores,
    exp(scores), unnormalized output).  The tile is additionally capped so the
    grid keeps at least min(bh, min_grid_steps) steps: that keeps the
    BlockSpec pipeline overlapping DMA with compute (mem-bound regime for
    small/medium N, NK) and gives both v7x TensorCores parallel grid steps.
    Only divisors of bh are considered, so no padded garbage blocks exist.
    """
    def padded(sub, lane, isz):
        return _round_up(max(sub, 1), 8) * _round_up(max(lane, 1), 128) * isz

    def cost(t):
        tiles = 2 * t * (padded(n, dh, itemsize)        # q tile (dbl-buffered)
                         + padded(nk, dh, itemsize)     # k tile
                         + padded(dv, nk, itemsize)     # v tile (lane-dense)
                         + padded(dv, n, itemsize))     # out tile (lane-dense)
        interm = t * (2 * padded(n, nk, 4)              # scores + exp(scores)
                      + padded(dv, n, 4))               # unnormalized f32 out
        return tiles + interm

    cap = max(1, -(-bh // min(bh, min_grid_steps)))
    best = 1
    for t in range(1, bh + 1):
        if bh % t == 0 and t <= cap and cost(t) <= vmem_budget:
            best = t
    return best


def geo_cross_attention(q, k, v, *, out_dim, num_heads=1, qk_scale=1,
                        bh_tile=None):
    """Pallas implementation of GeoCrossAttention.forward (eval mode:
    attn_drop and all *_map Identities are no-ops).

    q: (B, N, out_dim)   k: (B, NK, out_dim)   v: (B, NK, 3*num_heads)
    returns: (B, N, 3*num_heads)
    """
    B, N, _ = q.shape
    NK = k.shape[1]
    C = out_dim
    head_dim = C // num_heads
    v_head_dim = v.shape[-1] // num_heads
    # Matches the PyTorch module (`qk_scale or head_dim ** -0.5`):
    # a falsy qk_scale (None or 0) falls back to the default scale.
    scale = qk_scale or head_dim ** (-0.5)

    BH = B * num_heads
    if num_heads == 1:
        # Pure reshapes for q/k; v gets a cheap (B, NK, 3) -> (B, 3, NK)
        # transpose so the kernel sees a lane-dense v tile.
        qh = q.reshape(BH, N, head_dim)
        kh = k.reshape(BH, NK, head_dim)
        vh = v.reshape(BH, NK, v_head_dim).transpose(0, 2, 1)       # (BH, Dv, NK)
    else:
        # TODO(synk): for num_heads > 1, slice heads directly with per-head
        # BlockSpec index_maps instead of these XLA transposes (they cost an
        # extra HBM round trip over q/k before the mem-bound kernel runs).
        qh = q.reshape(B, N, num_heads, head_dim).transpose(0, 2, 1, 3)
        qh = qh.reshape(BH, N, head_dim)
        kh = k.reshape(B, NK, num_heads, head_dim).transpose(0, 2, 1, 3)
        kh = kh.reshape(BH, NK, head_dim)
        vh = v.reshape(B, NK, num_heads, v_head_dim).transpose(0, 2, 3, 1)
        vh = vh.reshape(BH, v_head_dim, NK)                          # (BH, Dv, NK)

    if bh_tile is None:
        bh_tile = _pick_bh_tile(BH, N, NK, head_dim, v_head_dim,
                                qh.dtype.itemsize)
    grid = (pl.cdiv(BH, bh_tile),)

    kernel = functools.partial(_geo_cross_attn_kernel, scale=float(scale))

    out = pl.pallas_call(
        kernel,
        out_shape=jax.ShapeDtypeStruct((BH, v_head_dim, N), q.dtype),
        grid=grid,
        in_specs=[
            pl.BlockSpec((bh_tile, N, head_dim), lambda i: (i, 0, 0)),
            pl.BlockSpec((bh_tile, NK, head_dim), lambda i: (i, 0, 0)),
            pl.BlockSpec((bh_tile, v_head_dim, NK), lambda i: (i, 0, 0)),
        ],
        out_specs=pl.BlockSpec((bh_tile, v_head_dim, N), lambda i: (i, 0, 0)),
        compiler_params=pltpu.CompilerParams(
            dimension_semantics=("parallel",),
            vmem_limit_bytes=32 << 20,
        ),
    )(qh, kh, vh)

    # (BH, Dv, N) -> (B, N, H*Dv).  The output is tiny (B*N*3*H elements), so
    # this wrapper transpose is far cheaper than lane-sparse stores in-kernel.
    out = out.reshape(B, num_heads, v_head_dim, N).transpose(0, 3, 1, 2)
    return out.reshape(B, N, num_heads * v_head_dim)


def _reference(q, k, v, *, out_dim, num_heads=1, qk_scale=1):
    """Pure-JAX reference mirroring the PyTorch forward."""
    B, N, _ = q.shape
    NK = k.shape[1]
    C = out_dim
    head_dim = C // num_heads
    scale = qk_scale or head_dim ** (-0.5)
    qh = q.reshape(B, N, num_heads, head_dim).transpose(0, 2, 1, 3)
    kh = k.reshape(B, NK, num_heads, head_dim).transpose(0, 2, 1, 3)
    vh = v.reshape(B, NK, num_heads, -1).transpose(0, 2, 1, 3)
    attn = jnp.einsum("bhnd,bhkd->bhnk", qh, kh) * scale
    attn = jax.nn.softmax(attn, axis=-1)
    x = jnp.einsum("bhnk,bhkd->bhnd", attn, vh).transpose(0, 2, 1, 3)
    return x.reshape(B, N, 3)


if __name__ == "__main__":
    # Module config (no learned params: all maps are nn.Identity, dropout=0).
    dim = 32
    out_dim = 32
    num_heads = 1
    qk_scale = 1

    key = jax.random.PRNGKey(0)

    # Case 1: the small example shape (B=2, N=8, NK=16, C=32, Dv=3).
    B, N, NK = 2, 8, 16
    kq, kk, kv, key = jax.random.split(key, 4)
    q = jax.random.normal(kq, (B, N, out_dim), dtype=jnp.float32)
    k = jax.random.normal(kk, (B, NK, out_dim), dtype=jnp.float32)
    v = jax.random.normal(kv, (B, NK, 3 * num_heads), dtype=jnp.float32)

    out = geo_cross_attention(q, k, v, out_dim=out_dim,
                              num_heads=num_heads, qk_scale=qk_scale)
    out = jax.block_until_ready(out)
    ref = _reference(q, k, v, out_dim=out_dim,
                     num_heads=num_heads, qk_scale=qk_scale)
    assert out.shape == (B, N, 3)
    assert jnp.allclose(out, ref, atol=1e-5, rtol=1e-5)

    # Case 2: a slightly larger batch to exercise a multi-step grid
    # (BH=4 -> grid=(4,), bh_tile=1) and the default-scale path (qk_scale=0
    # falls back to head_dim**-0.5, matching the PyTorch `or` semantics).
    B2, N2, NK2 = 4, 16, 32
    kq, kk, kv, key = jax.random.split(key, 4)
    q2 = jax.random.normal(kq, (B2, N2, out_dim), dtype=jnp.float32)
    k2 = jax.random.normal(kk, (B2, NK2, out_dim), dtype=jnp.float32)
    v2 = jax.random.normal(kv, (B2, NK2, 3 * num_heads), dtype=jnp.float32)

    out2 = geo_cross_attention(q2, k2, v2, out_dim=out_dim,
                               num_heads=num_heads, qk_scale=0)
    out2 = jax.block_until_ready(out2)
    ref2 = _reference(q2, k2, v2, out_dim=out_dim,
                      num_heads=num_heads, qk_scale=0)
    assert out2.shape == (B2, N2, 3)
    assert jnp.allclose(out2, ref2, atol=1e-5, rtol=1e-5)

    print("KERNEL_OK")
</pallas_src>

<mosaic_0001>
module attributes {stable_mosaic.version = 11 : i64} {
  func.func @_geo_cross_attn_kernel(%arg0: i32, %arg1: memref<1x8x32xf32, #tpu.memory_space<vmem>>, %arg2: memref<1x16x32xf32, #tpu.memory_space<vmem>>, %arg3: memref<1x3x16xf32, #tpu.memory_space<vmem>>, %arg4: memref<1x3x8xf32, #tpu.memory_space<vmem>>) attributes {dimension_semantics = [#tpu.dimension_semantics<parallel>], iteration_bounds = array<i64: 2>, scalar_prefetch = 0 : i64, scratch_operands = 0 : i64, tpu.core_type = #tpu.core_type<tc>, window_params = [{transform_indices = @transform_0, window_bounds = array<i64: 1, 8, 32>}, {transform_indices = @transform_1, window_bounds = array<i64: 1, 16, 32>}, {transform_indices = @transform_2, window_bounds = array<i64: 1, 3, 16>}, {transform_indices = @transform_3, window_bounds = array<i64: 1, 3, 8>}]} {
    %c0 = arith.constant 0 : index
    %c0_0 = arith.constant 0 : index
    %c0_1 = arith.constant 0 : index
    %0 = vector.load %arg1[%c0, %c0_0, %c0_1] : memref<1x8x32xf32, #tpu.memory_space<vmem>>, vector<1x8x32xf32>
    %c0_2 = arith.constant 0 : index
    %c0_3 = arith.constant 0 : index
    %c0_4 = arith.constant 0 : index
    %1 = vector.load %arg2[%c0_2, %c0_3, %c0_4] : memref<1x16x32xf32, #tpu.memory_space<vmem>>, vector<1x16x32xf32>
    %c0_5 = arith.constant 0 : index
    %c0_6 = arith.constant 0 : index
    %c0_7 = arith.constant 0 : index
    %2 = vector.load %arg3[%c0_5, %c0_6, %c0_7] : memref<1x3x16xf32, #tpu.memory_space<vmem>>, vector<1x3x16xf32>
    %cst = arith.constant dense<0.000000e+00> : vector<1x8x16xf32>
    %3 = tpu.matmul %0, %1, %cst {dimension_numbers = #tpu.dot_dimension_numbers<[2], [2], [1], [1], [0, 0, 0, 1, 1, 1], [0], [0]>} : vector<1x8x32xf32>, vector<1x16x32xf32>, vector<1x8x16xf32> -> vector<1x8x16xf32>
    %cst_8 = arith.constant dense<0xFF800000> : vector<1x8xf32>
    %4 = vector.multi_reduction <maximumf>, %3, %cst_8 [2] : vector<1x8x16xf32> to vector<1x8xf32>
    %5 = vector.shape_cast %4 : vector<1x8xf32> to vector<1x8x1xf32>
    %6 = vector.broadcast %5 : vector<1x8x1xf32> to vector<1x8x16xf32>
    %7 = arith.subf %3, %6 : vector<1x8x16xf32>
    %8 = math.exp %7 : vector<1x8x16xf32>
    %cst_9 = arith.constant dense<0.000000e+00> : vector<1x8xf32>
    %9 = vector.multi_reduction <add>, %8, %cst_9 [2] : vector<1x8x16xf32> to vector<1x8xf32>
    %cst_10 = arith.constant dense<0.000000e+00> : vector<1x3x8xf32>
    %10 = tpu.matmul %2, %8, %cst_10 {dimension_numbers = #tpu.dot_dimension_numbers<[2], [2], [1], [1], [0, 0, 0, 1, 1, 1], [0], [0]>} : vector<1x3x16xf32>, vector<1x8x16xf32>, vector<1x3x8xf32> -> vector<1x3x8xf32>
    %11 = tpu.reciprocal %9 {approx = true} : vector<1x8xf32> -> vector<1x8xf32>
    %12 = arith.mulf %9, %11 : vector<1x8xf32>
    %cst_11 = arith.constant 2.000000e+00 : f32
    %13 = vector.broadcast %cst_11 : f32 to vector<1x8xf32>
    %14 = arith.subf %13, %12 : vector<1x8xf32>
    %15 = arith.mulf %11, %14 : vector<1x8xf32>
    %16 = vector.shape_cast %15 : vector<1x8xf32> to vector<1x1x8xf32>
    %17 = vector.broadcast %16 : vector<1x1x8xf32> to vector<1x3x8xf32>
    %18 = arith.mulf %10, %17 : vector<1x3x8xf32>
    %c0_12 = arith.constant 0 : index
    %c0_13 = arith.constant 0 : index
    %c0_14 = arith.constant 0 : index
    %19 = vector.load %arg4[%c0_12, %c0_13, %c0_14] : memref<1x3x8xf32, #tpu.memory_space<vmem>>, vector<1x3x8xf32>
    tpu.vector_store %arg4[%c0_12, %c0_13, %c0_14], %18 {strides = array<i32>} : memref<1x3x8xf32, #tpu.memory_space<vmem>>, vector<1x3x8xf32>,
    return
  }
  func.func @transform_0(%arg0: i32) -> (i32, i32, i32) {
    %c0_i32 = arith.constant 0 : i32
    %c0_i32_0 = arith.constant 0 : i32
    %c0_i32_1 = arith.constant 0 : i32
    return %arg0, %c0_i32, %c0_i32_0 : i32, i32, i32
  }
  func.func @transform_1(%arg0: i32) -> (i32, i32, i32) {
    %c0_i32 = arith.constant 0 : i32
    %c0_i32_0 = arith.constant 0 : i32
    %c0_i32_1 = arith.constant 0 : i32
    return %arg0, %c0_i32, %c0_i32_0 : i32, i32, i32
  }
  func.func @transform_2(%arg0: i32) -> (i32, i32, i32) {
    %c0_i32 = arith.constant 0 : i32
    %c0_i32_0 = arith.constant 0 : i32
    %c0_i32_1 = arith.constant 0 : i32
    return %arg0, %c0_i32, %c0_i32_0 : i32, i32, i32
  }
  func.func @transform_3(%arg0: i32) -> (i32, i32, i32) {
    %c0_i32 = arith.constant 0 : i32
    %c0_i32_0 = arith.constant 0 : i32
    %c0_i32_1 = arith.constant 0 : i32
    return %arg0, %c0_i32, %c0_i32_0 : i32, i32, i32
  }
}

</mosaic_0001>

<bundles_post_ra>
// kernel: tpu_custom_call.1
= control target key start
LH: loop header
LB: loop body
LE: loop exit
PB: predicated region body
PF: predicated region fallthrough
CT: control target
= control target key end

     0   :  { %8 = vsyncpa [#allocation3], 0  ;;  %s759_s0 = inlined_call_operand.hbm [shape: f32[2,8,32], index: 0, kind: input, shape index: {}]   ;;  %s760_s1 = inlined_call_operand.hbm [shape: f32[2,16,32], index: 1, kind: input, shape index: {}]   ;;  %s761_s2 = inlined_call_operand.vmem [shape: f32[2,3,16], index: 2, kind: input, shape index: {}]   ;;  %s762_s3 = inlined_call_operand.vmem [shape: f32[2,3,8], index: 3, kind: output, shape index: {}]  }
   0x1   :  { %10 = vsyncpa [#allocation3 + $0x1], 0 }
   0x2   :  { %11 = vsyncpa [#allocation5], 0 }
   0x3   :  { %13 = vsyncpa [#allocation5 + $0x1], 0  ;;  %s624_s12 = smov 0   ;;  %s626_s13 = smov 0  }
   0x4   :  { %s628_s14 = smov 0   ;;  %s630_s15 = smov 0  }
   0x5 LB: > { %s643_s16 = sadd.s32 4294967295, %s600_s15   ;;  %s646_s17 = sadd.s32 1, %s600_s15   ;;  %s600_s15 = sphi %s630_s15, %s770_s15   ;;  %s596_s14 = sphi %s628_s14, %s769_s14   ;;  %s592_s13 = sphi %s626_s13, %s768_s13   ;;  %s588_s12 = sphi %s624_s12, %s767_s12  }
   0x6   : > { %s23_s18 = ssub.s32 %s600_s15, %s646_s17  ;;  %s26_s19 = sadd.s32 1, %s596_s14 }
   0x7   : > { %p24_p0 = scmp.eq.s32.totalorder %s23_s18, 0  ;;  %p33_p1 = scmp.ne.s32.totalorder %s596_s14, %s592_s13 }
   0x8   : > { %p34_p2 = scmp.eq.s32.totalorder %s600_s15, 0  ;;  %p39_p3 = scmp.ne.s32.totalorder %s592_s13, %s588_s12 }
   0x9   : > { %s656_s20 = scalar_select %p24_p0, %s596_s14, %s26_s19  }
   0xa   : > { %p658_p4 = por %p34_p2, %p33_p1  ;;  %p40_p5 = scmp.eq.s32.totalorder %s643_s16, 0 }
   0xb   : > { %p463_p6 = scmp.lt.s32.totalorder %s600_s15, 2  ;;  %s669_s23 = sand.u32 1, %s596_s14  }
   0xc   : > { %p664_p7 = por %p40_p5, %p39_p3  ;;  %s434_s24 = sshll.u32 %s669_s23, 3 }
   0xd   : > { %s435_s25 = sshll.u32 %s600_s15, 3  ;;  %s145_s29 = scalar_lea.vmem [#allocation2], %s434_s24 }
   0xe   : > { %s149_s28 = scalar_lea.hbm %s759_s0, %s435_s25  ;;  %s153_s30 = sshll.u32 %s145_s29, 4  ;;  %s154_s30 = int_to_ptr.vmem [resolvable:$true] %s153_s30 }
   0xf   : > { %s151_s4 = sshll.u32 %s149_s28, 4  ;;  %p678_p8 = pnand %p463_p6, %p658_p4  ;;  %s152_s4 = int_to_ptr.hbm [resolvable:$true] %s151_s4 }
  0x10   : > { %p439_p9 = scmp.ge.s32.totalorder %s600_s15, 1  ;;  %p187_p10 = scmp.lt.s32.totalorder %s600_s15, 3 }
  0x11   : > { %s142_s6 = scalar_lea.sflag [#allocation3], %s669_s23  ;;  %s502_s7 = sshra.s32 %s152_s4, 4  ;;  %s503_s7 = int_to_ptr.hbm [resolvable:$true] %s502_s7 }
  0x12   : > { %s504_s8 = scalar_lea.hbm %s503_s7, 8  ;;  %p506_p12 = pneg %p678_p8 }
  0x13   : > { %p505_p11 = scmp.ne.s32.totalorder %s503_s7, %s504_s8  ;;  %s509_s11 = scalar_lea.hbm %s759_s0, 16 }
  0x14   : > { %p510_p1 = scmp.lt.s32.totalorder %s503_s7, %s759_s0  ;;  %p511_p2 = scmp.lt.s32.totalorder %s509_s11, %s504_s8 }
  0x15   : > { %p507_p13 = pnand %p506_p12, %p505_p11 }
  0x16   : > { %p512_p3 = por %p511_p2, %p510_p1 }
  0x17   : > { %p508_p0 = pneg %p507_p13 }
  0x19   : > { %p513_p4 = pnand %p512_p3, %p508_p0 }
  0x1b   : > { %516 = shalt.err (!%p513_p4)
}
  0x1c   : > { %459 = dma.hbm_to_vmem [thread:$0]  (!%p678_p8), %s152_s4, 128, %s154_s30, %s142_s6  }
  0x1d   : > { %p702_p5 = pnand %p439_p9, %p187_p10  ;;  %s436_s21 = sshll.u32 %s669_s23, 4 }
  0x1e   : > { %s451_s24 = sshll.u32 %s600_s15, 4  ;;  %s164_s28 = scalar_lea.vmem [#allocation4], %s436_s21 }
  0x1f   : > { %s169_s27 = scalar_lea.hbm %s760_s1, %s451_s24  ;;  %s172_s29 = sshll.u32 %s164_s28, 4  ;;  %s173_s29 = int_to_ptr.vmem [resolvable:$true] %s172_s29 }
  0x20   : > { %s170_s7 = sshll.u32 %s169_s27, 4  ;;  %s161_s8 = scalar_lea.sflag [#allocation5], %s669_s23  ;;  %s171_s7 = int_to_ptr.hbm [resolvable:$true] %s170_s7 }
  0x21   : > { %s532_s9 = sshra.s32 %s171_s7, 4  ;;  %s539_s6 = scalar_lea.hbm %s760_s1, 32  ;;  %s533_s9 = int_to_ptr.hbm [resolvable:$true] %s532_s9 }
  0x22   : > { %s534_s30 = scalar_lea.hbm %s533_s9, 16  ;;  %p540_p11 = scmp.lt.s32.totalorder %s533_s9, %s760_s1 }
  0x23   : > { %p535_p6 = scmp.ne.s32.totalorder %s533_s9, %s534_s30  ;;  %p541_p13 = scmp.lt.s32.totalorder %s539_s6, %s534_s30 }
  0x25   : > { %p537_p9 = pnand %p535_p6, %p506_p12  ;;  %p542_p0 = por %p541_p13, %p540_p11 }
  0x27   : > { %p538_p10 = pneg %p537_p9 }
  0x29   : > { %p543_p1 = pnand %p542_p0, %p538_p10 }
  0x2b   : > { %546 = shalt.err (!%p543_p1)
}
  0x2c   : > { %s602_s23 = smov 128   ;;  %s603_s12 = smov 8  }
  0x2d   : > { %462 = dma.hbm_to_vmem [thread:$0]  (!%p678_p8), %s171_s7, 256, %s173_s29, %s161_s8, %s602_s23, %s602_s23, %s603_s12  }
  0x2e   : > { %191 = sbr.rel (%p702_p5) target bundleno = 452 (0x1c4), region = 32  ;;  %s193_s18 = sand.u32 (!%p702_p5), 1, %s592_s13  }
  0x2f   : > { %s440_s21 = sshll.u32 (!%p702_p5), %s193_s18, 3  ;;  %s194_s24 = scalar_lea.sflag (!%p702_p5), [#allocation3], %s193_s18 }
  0x30   : > { %s197_s25 = scalar_lea.vmem (!%p702_p5), [#allocation2], %s440_s21 }
  0x33   : > { %579 = dma.done.wait (%p664_p7), %s194_s24, 128  }
  0x34   : > { %581 = vsyncadd (%p664_p7), %s194_s24, 4294967168  ;;  %s441_s26 = sshll.u32 %s193_s18, 4  ;;  %s204_s27 = scalar_lea.sflag [#allocation5], %s193_s18 }
  0x35   : > { %s207_s28 = scalar_lea.vmem [#allocation4], %s441_s26 }
  0x36   : > { %583 = dma.done.wait (%p664_p7), %s204_s27, 256  }
  0x37   : > { %585 = vsyncadd (%p664_p7), %s204_s27, 4294967040  ;;  %vm251_vm0 = vcmask 261120   ;;  %v249_v0 = vld [vmem:[%s207_s28 + $0x8] sm:$0xff]  ;;  %v248_v1 = vld [vmem:[%s207_s28] sm:$0xff]  ;;  %vm281_vm1 = vcmask 130048   ;;  %p239_p8 = scmp.lt.s32.totalorder %s643_s16, 1  ;;  %v322_v12 = vlaneseq }
  0x38   : > { %444 = vmatpush.xpose.msk.msra.mxu0 %vm251_vm0, %v249_v0  ;;  %v247_v2 = vld [vmem:[%s197_s25] sm:$0xff]  ;;  %vm329_vm2 = vcmask 59392  }
  0x39   : > { %s772_s16 = smov (!%p239_p8, %s643_s16), 1  ;;  %v323_v16 = vand.u32 127, %v322_v12 }
  0x3a   : > { %s442_s22 = sshll.u32 %s772_s16, 2 }
  0x3b   : > { %s242_s29 = scalar_lea.vmem %s761_s2, %s442_s22  ;;  %s246_s8 = scalar_lea.vmem %s762_s3, %s442_s22 }
  0x3c   : > { %445 = vmatpush.xpose.msk.msra.mxu0 %vm251_vm0, %v248_v1  ;;  %v250_v10 = vld [vmem:[%s242_s29] sm:$0x7] }
  0x3f   : > { %446 = vmatmul.msk.f32.vlgmr.msra.gmra.mxu0 %vm251_vm0, %v247_v2 }
  0xbc   : > { %v278_v3 = vpop.f32.mrf.mxu0 }
  0xbd   : > { %v282_v4 = vsel %vm281_vm1, %v278_v3, -inf }
  0xbe   : > { %283 = vmax.xlane.f32.xlu0 %v282_v4 }
 0x131   : > { %v284_v5 = vpop.xlane.xlu0 %283 }
 0x132   : > { %v285_v6 = vsub.f32 %v278_v3, %v284_v5 }
 0x134   : > { %v286_v7 = vmul.f32 1.442695, %v285_v6 }
 0x136   : > { %498 = vpow2.f32 %v286_v7 }
 0x13c   : > { %v499_v8 = vpop.eup %498 }
 0x13d   : > { %447 = vmatpush.xpose.msk.msra.mxu1 %vm281_vm1, %v499_v8  ;;  %v288_v9 = vsel %vm281_vm1, %v499_v8, 0.0 }
 0x13e   : > { %289 = vadd.xlane.f32.xlu0 %v288_v9 }
 0x140   : > { %448 = vmatmul.msk.f32.vlgmr.msra.gmra.mxu1 %vm281_vm1, %v250_v10 }
 0x1b1   : > { %v290_v11 = vpop.xlane.xlu0 %289 }
 0x1b2   : > { %500 = vrcp.f32 %v290_v11 }
 0x1b8   : > { %v501_v13 = vpop.eup %500 }
 0x1b9   : > { %v318_v14 = vmul.f32 %v501_v13, %v290_v11 }
 0x1bb   : > { %v319_v15 = vsub.f32 2.0, %v318_v14 }
 0x1bd   : > { %v320_v17 = vmul.f32 %v501_v13, %v319_v15  ;;  %v314_v18 = vpop.f32.mrf.mxu1 }
 0x1bf   : > { %v324_v19 = vperm.slane %v320_v17, %v323_v16 }
 0x1c1   : > { %v328_v20 = vmul.f32 %v324_v19, %v314_v18 }
 0x1c3   : > { %330 = vst.msk [vmem:[%s246_s8] sm:$0x7] %vm329_vm2, %v328_v20 }
 0x1c4 PF: > { %p16_p7 = scmp.ge.s32.totalorder %s646_s17, 4   ;;  %s767_s12 = smov %s592_s13 }
 0x1c5   : > { %s768_s13 = smov %s596_s14  ;;  %s769_s14 = smov %s656_s20 }
 0x1c6   : > { %s770_s15 = smov %s646_s17  ;;  %18 = sbr.rel (!%p16_p7) target bundleno = 5 (0x5), region = 88 }
 0x1cb   :  { %350 = vsyncpa [#allocation3], 1 }
 0x1cc   :  { %352 = vsyncpa [#allocation3 + $0x1], 1 }
 0x1cd   :  { %353 = vsyncpa [#allocation5], 1 }
 0x1ce   :  { %355 = vsyncpa [#allocation5 + $0x1], 1 }

</bundles_post_ra>
